<compile_context>
chip_gen: v6e
topology: v6e:2x2x1
jax: 0.10.0
libtpu: 0.0.40
codegen_flags: <defaults>
</compile_context>

<pallas_src>
import functools

import jax
import jax.numpy as jnp
from jax.experimental import pallas as pl
from jax.experimental.pallas import tpu as pltpu

LANE = 128  # vreg lane width -> layer-output padding target


def _round_up(n, m):
    return ((n + m - 1) // m) * m


def _make_fused_mlp_kernel(num_layers, compute_dtype):
    """Kernel computing all [Linear -> ReLU -> Dropout(eval)] blocks in one body.

    refs = (x_ref, w0_ref, b0_ref, w1_ref, b1_ref, ..., o_ref)
    x tile:  (TB, Din)         input dtype (cast to bf16 in-kernel, VPU-cheap)
    w_i:     (K_i, Np_{i+1})   bf16, full array, VMEM-resident across tiles
    b_i:     (1, Np_{i+1})     f32,  full array, VMEM-resident across tiles
    o tile:  (TB, Np_out)      bf16, lane-dense (Np_out % 128 == 0)
    """

    def kernel(*refs):
        x_ref = refs[0]
        o_ref = refs[-1]
        h = x_ref[...].astype(compute_dtype)  # cast once, in-kernel (no HBM copy)
        for li in range(num_layers):
            w_ref = refs[1 + 2 * li]
            b_ref = refs[2 + 2 * li]
            acc = jnp.dot(h, w_ref[...], preferred_element_type=jnp.float32)
            act = jnp.maximum(acc + b_ref[...], 0.0)  # f32 epilogue
            # Dropout(p) in eval mode is identity.
            if li + 1 < num_layers:
                h = act.astype(compute_dtype)  # back to bf16 for next MXU pass
            else:
                o_ref[...] = act.astype(o_ref.dtype)  # lane-dense bf16 store

    return kernel


def init_mlp_params(key, input_dim, layers=None, compute_dtype=jnp.bfloat16):
    """Parameter init mirroring MLPNet.__init__ shapes.

    PyTorch Linear weight is (out, in); we store the transpose (in, out).
    Only layer *output* widths are zero-padded to a multiple of 128; the first
    layer keeps K = input_dim so x needs no feature padding.  Weights are bf16
    (MXU inputs), biases stay f32 (epilogue).  Returns (params, dims) where
    dims are the true (unpadded) layer widths.
    """
    if layers is None or len(layers) == 0:
        layers = [input_dim // 2, input_dim // 4]
    dims = [input_dim] + list(layers)
    out_pad = [_round_up(d, LANE) for d in layers]  # padded N of each layer
    in_pad = [input_dim] + out_pad[:-1]             # K of each layer

    params = []
    for i in range(len(layers)):
        key, kw, kb = jax.random.split(key, 3)
        fan_in = dims[i]
        bound = 1.0 / (fan_in ** 0.5)
        w = jax.random.uniform(
            kw, (dims[i], dims[i + 1]), jnp.float32, -bound, bound)
        b = jax.random.uniform(
            kb, (dims[i + 1],), jnp.float32, -bound, bound)
        # Zero padding in K rows / N cols / bias entries guarantees padded
        # lanes stay exactly zero through every layer.
        w_pad = (
            jnp.zeros((in_pad[i], out_pad[i]), jnp.float32)
            .at[: dims[i], : dims[i + 1]].set(w)
            .astype(compute_dtype)
        )
        b_pad = (
            jnp.zeros((1, out_pad[i]), jnp.float32)
            .at[:, : dims[i + 1]].set(b)
        )
        params.append((w_pad, b_pad))
    return params, dims


@functools.partial(
    jax.jit,
    static_argnames=("true_out_dim", "batch_tile", "single_buffer_weights",
                     "slice_output"),
)
def _mlpnet_forward_impl(x, params, *, true_out_dim, batch_tile,
                         single_buffer_weights, slice_output):
    bsz, din = x.shape
    num_layers = len(params)
    compute_dtype = params[0][0].dtype
    dp_out = params[-1][0].shape[1]
    out_dtype = compute_dtype  # bf16 output: half the HBM write-back of f32

    # Batch tile: multiple of the dtype sublane pack (16 for bf16, 8 for f32),
    # capped so the grid has >= 2 steps whenever the batch can be split
    # (v7x has 2 TensorCores; on v5e/v6e the extra step costs ~0.35 us).
    pack = 16 if compute_dtype == jnp.bfloat16 else 8
    tb = min(int(batch_tile), _round_up(bsz, pack))
    if bsz > pack:
        tb = min(tb, _round_up(pl.cdiv(bsz, 2), pack))
    tb = max(pack, _round_up(tb, pack))  # enforce (8/16,128)-friendly tiling
    grid = pl.cdiv(bsz, tb)              # ragged last tile handled by Pallas

    # Resident weights/biases: constant block index -> stay in VMEM across
    # batch tiles.  Buffered(1) drops the pointless double-buffer (halves the
    # resident-weight VMEM footprint, decisive on v7x's 64 MiB VMEM).
    def const_spec(shape):
        if single_buffer_weights:
            return pl.BlockSpec(shape, lambda i: (0, 0),
                                pipeline_mode=pl.Buffered(1))
        return pl.BlockSpec(shape, lambda i: (0, 0))

    # x is passed un-padded, un-cast: block = (tb, din) with din full-extent.
    in_specs = [pl.BlockSpec((tb, din), lambda i: (i, 0))]
    flat_params = []
    for w, b in params:
        in_specs.append(const_spec(w.shape))
        in_specs.append(const_spec(b.shape))
        flat_params.extend([w, b])

    # Explicit scoped-VMEM budget (defaults: 16 MiB v5e / 32 MiB v6e, v7x).
    wbuf = 1 if single_buffer_weights else 2
    weight_bytes = sum(
        int(w.size) * w.dtype.itemsize + int(b.size) * b.dtype.itemsize
        for w, b in params)
    tile_bytes = (tb * din * x.dtype.itemsize
                  + tb * dp_out * jnp.dtype(out_dtype).itemsize)
    act_bytes = sum(tb * w.shape[1] * 6 for w, _ in params)  # f32 acc + bf16 h
    need = 2 * tile_bytes + wbuf * weight_bytes + act_bytes
    # Headroom; cap at v7x's 64 MiB physical VMEM.
    vmem_limit = int(min(max(need + max(need // 4, 2 << 20), 16 << 20),
                         64 << 20))

    out = pl.pallas_call(
        _make_fused_mlp_kernel(num_layers, compute_dtype),
        out_shape=jax.ShapeDtypeStruct((bsz, dp_out), out_dtype),
        grid_spec=pltpu.PrefetchScalarGridSpec(
            num_scalar_prefetch=0,
            grid=(grid,),
            in_specs=in_specs,
            out_specs=pl.BlockSpec((tb, dp_out), lambda i: (i, 0)),
        ),
        compiler_params=pltpu.CompilerParams(
            # Batch tiles are independent -> shard across TCs on v7x.
            dimension_semantics=("parallel",),
            vmem_limit_bytes=vmem_limit,
        ),
    )(x, *flat_params)

    if slice_output:
        # Trim the 128-lane padding back to the true layer width.  Consumers
        # that can accept the zero-padded lane slab should pass
        # slice_output=False and avoid this extra XLA slice kernel.
        out = out[:, :true_out_dim]
    return out


def mlpnet_forward(x, params, *, true_out_dim, batch_tile=512,
                   slice_output=True):
    """Fused MLP forward. x: (B, Din) -> (B, true_out_dim) bf16."""
    try:
        return _mlpnet_forward_impl(
            x, params, true_out_dim=true_out_dim, batch_tile=batch_tile,
            single_buffer_weights=True, slice_output=slice_output)
    except Exception:
        # Older JAX without BlockSpec.pipeline_mode / Buffered(1): fall back to
        # default double-buffered resident weights (correctness identical).
        return _mlpnet_forward_impl(
            x, params, true_out_dim=true_out_dim, batch_tile=batch_tile,
            single_buffer_weights=False, slice_output=slice_output)


if __name__ == "__main__":
    key = jax.random.PRNGKey(0)
    batch, input_dim = 8, 32  # default layers -> [16, 8]

    k_x, k_p = jax.random.split(key)
    x = jax.random.normal(k_x, (batch, input_dim), dtype=jnp.float32)
    params, dims = init_mlp_params(k_p, input_dim)
    true_out_dim = dims[-1]

    out = mlpnet_forward(x, params, true_out_dim=true_out_dim)
    jax.block_until_ready(out)

    # Pure-JAX reference with identical numerics (bf16 matmul inputs, f32
    # accumulate, f32 bias/ReLU epilogue, bf16 between layers and at output).
    compute_dtype = params[0][0].dtype
    h = x.astype(compute_dtype)
    for w, b in params:
        act = jnp.maximum(
            jnp.dot(h, w, preferred_element_type=jnp.float32) + b, 0.0)
        h = act.astype(compute_dtype)
    ref = h[:, :true_out_dim]

    assert out.shape == (batch, true_out_dim)
    assert out.dtype == compute_dtype
    assert jnp.allclose(out.astype(jnp.float32), ref.astype(jnp.float32),
                        atol=2e-2, rtol=2e-2)

    print("KERNEL_OK")
</pallas_src>

<mosaic_0001>
module attributes {stable_mosaic.version = 11 : i64} {
  func.func @kernel(%arg0: i32, %arg1: memref<16x32xf32, #tpu.memory_space<vmem>>, %arg2: memref<32x128xbf16, #tpu.memory_space<vmem>>, %arg3: memref<1x128xf32, #tpu.memory_space<vmem>>, %arg4: memref<128x128xbf16, #tpu.memory_space<vmem>>, %arg5: memref<1x128xf32, #tpu.memory_space<vmem>>, %arg6: memref<16x128xbf16, #tpu.memory_space<vmem>>) attributes {dimension_semantics = [#tpu.dimension_semantics<parallel>], iteration_bounds = array<i64: 1>, scalar_prefetch = 0 : i64, scratch_operands = 0 : i64, tpu.core_type = #tpu.core_type<tc>, window_params = [{transform_indices = @transform_0, window_bounds = array<i64: 16, 32>}, {pipeline_mode = #tpu.pipeline_mode<synchronous>, transform_indices = @transform_1, window_bounds = array<i64: 32, 128>}, {pipeline_mode = #tpu.pipeline_mode<synchronous>, transform_indices = @transform_2, window_bounds = array<i64: 1, 128>}, {pipeline_mode = #tpu.pipeline_mode<synchronous>, transform_indices = @transform_3, window_bounds = array<i64: 128, 128>}, {pipeline_mode = #tpu.pipeline_mode<synchronous>, transform_indices = @transform_4, window_bounds = array<i64: 1, 128>}, {transform_indices = @transform_5, window_bounds = array<i64: 16, 128>}]} {
    %c0 = arith.constant 0 : index
    %c0_0 = arith.constant 0 : index
    %0 = vector.load %arg1[%c0, %c0_0] : memref<16x32xf32, #tpu.memory_space<vmem>>, vector<16x32xf32>
    %1 = arith.truncf %0 : vector<16x32xf32> to vector<16x32xbf16>
    %c0_1 = arith.constant 0 : index
    %c0_2 = arith.constant 0 : index
    %2 = vector.load %arg2[%c0_1, %c0_2] : memref<32x128xbf16, #tpu.memory_space<vmem>>, vector<32x128xbf16>
    %cst = arith.constant dense<0.000000e+00> : vector<16x128xf32>
    %3 = tpu.matmul %1, %2, %cst {dimension_numbers = #tpu.dot_dimension_numbers<[1], [0], [0], [1], [0, 0, 1, 1], [], []>} : vector<16x32xbf16>, vector<32x128xbf16>, vector<16x128xf32> -> vector<16x128xf32>
    %c0_3 = arith.constant 0 : index
    %c0_4 = arith.constant 0 : index
    %4 = vector.load %arg3[%c0_3, %c0_4] : memref<1x128xf32, #tpu.memory_space<vmem>>, vector<1x128xf32>
    %5 = vector.broadcast %4 : vector<1x128xf32> to vector<16x128xf32>
    %6 = arith.addf %3, %5 : vector<16x128xf32>
    %cst_5 = arith.constant 0.000000e+00 : f32
    %7 = vector.broadcast %cst_5 : f32 to vector<16x128xf32>
    %8 = arith.maximumf %6, %7 : vector<16x128xf32>
    %9 = arith.truncf %8 : vector<16x128xf32> to vector<16x128xbf16>
    %c0_6 = arith.constant 0 : index
    %c0_7 = arith.constant 0 : index
    %10 = vector.load %arg4[%c0_6, %c0_7] : memref<128x128xbf16, #tpu.memory_space<vmem>>, vector<128x128xbf16>
    %cst_8 = arith.constant dense<0.000000e+00> : vector<16x128xf32>
    %11 = tpu.matmul %9, %10, %cst_8 {dimension_numbers = #tpu.dot_dimension_numbers<[1], [0], [0], [1], [0, 0, 1, 1], [], []>} : vector<16x128xbf16>, vector<128x128xbf16>, vector<16x128xf32> -> vector<16x128xf32>
    %c0_9 = arith.constant 0 : index
    %c0_10 = arith.constant 0 : index
    %12 = vector.load %arg5[%c0_9, %c0_10] : memref<1x128xf32, #tpu.memory_space<vmem>>, vector<1x128xf32>
    %13 = vector.broadcast %12 : vector<1x128xf32> to vector<16x128xf32>
    %14 = arith.addf %11, %13 : vector<16x128xf32>
    %cst_11 = arith.constant 0.000000e+00 : f32
    %15 = vector.broadcast %cst_11 : f32 to vector<16x128xf32>
    %16 = arith.maximumf %14, %15 : vector<16x128xf32>
    %17 = arith.truncf %16 : vector<16x128xf32> to vector<16x128xbf16>
    %c0_12 = arith.constant 0 : index
    %c0_13 = arith.constant 0 : index
    %18 = vector.load %arg6[%c0_12, %c0_13] : memref<16x128xbf16, #tpu.memory_space<vmem>>, vector<16x128xbf16>
    tpu.vector_store %arg6[%c0_12, %c0_13], %17 {strides = array<i32>} : memref<16x128xbf16, #tpu.memory_space<vmem>>, vector<16x128xbf16>,
    return
  }
  func.func @transform_0(%arg0: i32) -> (i32, i32) {
    %c0_i32 = arith.constant 0 : i32
    %c0_i32_0 = arith.constant 0 : i32
    return %arg0, %c0_i32 : i32, i32
  }
  func.func @transform_1(%arg0: i32) -> (i32, i32) {
    %c0_i32 = arith.constant 0 : i32
    %c0_i32_0 = arith.constant 0 : i32
    %c0_i32_1 = arith.constant 0 : i32
    return %c0_i32, %c0_i32_0 : i32, i32
  }
  func.func @transform_2(%arg0: i32) -> (i32, i32) {
    %c0_i32 = arith.constant 0 : i32
    %c0_i32_0 = arith.constant 0 : i32
    %c0_i32_1 = arith.constant 0 : i32
    return %c0_i32, %c0_i32_0 : i32, i32
  }
  func.func @transform_3(%arg0: i32) -> (i32, i32) {
    %c0_i32 = arith.constant 0 : i32
    %c0_i32_0 = arith.constant 0 : i32
    %c0_i32_1 = arith.constant 0 : i32
    return %c0_i32, %c0_i32_0 : i32, i32
  }
  func.func @transform_4(%arg0: i32) -> (i32, i32) {
    %c0_i32 = arith.constant 0 : i32
    %c0_i32_0 = arith.constant 0 : i32
    %c0_i32_1 = arith.constant 0 : i32
    return %c0_i32, %c0_i32_0 : i32, i32
  }
  func.func @transform_5(%arg0: i32) -> (i32, i32) {
    %c0_i32 = arith.constant 0 : i32
    %c0_i32_0 = arith.constant 0 : i32
    return %arg0, %c0_i32 : i32, i32
  }
}

module attributes {stable_mosaic.version = 11 : i64} {
  func.func @kernel(%arg0: i32, %arg1: memref<16x32xf32, #tpu.memory_space<vmem>>, %arg2: memref<32x128xbf16, #tpu.memory_space<vmem>>, %arg3: memref<1x128xf32, #tpu.memory_space<vmem>>, %arg4: memref<128x128xbf16, #tpu.memory_space<vmem>>, %arg5: memref<1x128xf32, #tpu.memory_space<vmem>>, %arg6: memref<16x128xbf16, #tpu.memory_space<vmem>>) attributes {dimension_semantics = [#tpu.dimension_semantics<parallel>], iteration_bounds = array<i64: 1>, scalar_prefetch = 0 : i64, scratch_operands = 0 : i64, tpu.core_type = #tpu.core_type<tc>, window_params = [{transform_indices = @transform_0, window_bounds = array<i64: 16, 32>}, {pipeline_mode = #tpu.pipeline_mode<synchronous>, transform_indices = @transform_1, window_bounds = array<i64: 32, 128>}, {pipeline_mode = #tpu.pipeline_mode<synchronous>, transform_indices = @transform_2, window_bounds = array<i64: 1, 128>}, {pipeline_mode = #tpu.pipeline_mode<synchronous>, transform_indices = @transform_3, window_bounds = array<i64: 128, 128>}, {pipeline_mode = #tpu.pipeline_mode<synchronous>, transform_indices = @transform_4, window_bounds = array<i64: 1, 128>}, {transform_indices = @transform_5, window_bounds = array<i64: 16, 128>}]} {
    %c0 = arith.constant 0 : index
    %c0_0 = arith.constant 0 : index
    %0 = vector.load %arg1[%c0, %c0_0] : memref<16x32xf32, #tpu.memory_space<vmem>>, vector<16x32xf32>
    %1 = arith.truncf %0 : vector<16x32xf32> to vector<16x32xbf16>
    %c0_1 = arith.constant 0 : index
    %c0_2 = arith.constant 0 : index
    %2 = vector.load %arg2[%c0_1, %c0_2] : memref<32x128xbf16, #tpu.memory_space<vmem>>, vector<32x128xbf16>
    %cst = arith.constant dense<0.000000e+00> : vector<16x128xf32>
    %3 = tpu.matmul %1, %2, %cst {dimension_numbers = #tpu.dot_dimension_numbers<[1], [0], [0], [1], [0, 0, 1, 1], [], []>} : vector<16x32xbf16>, vector<32x128xbf16>, vector<16x128xf32> -> vector<16x128xf32>
    %c0_3 = arith.constant 0 : index
    %c0_4 = arith.constant 0 : index
    %4 = vector.load %arg3[%c0_3, %c0_4] : memref<1x128xf32, #tpu.memory_space<vmem>>, vector<1x128xf32>
    %5 = vector.broadcast %4 : vector<1x128xf32> to vector<16x128xf32>
    %6 = arith.addf %3, %5 : vector<16x128xf32>
    %cst_5 = arith.constant 0.000000e+00 : f32
    %7 = vector.broadcast %cst_5 : f32 to vector<16x128xf32>
    %8 = arith.maximumf %6, %7 : vector<16x128xf32>
    %9 = arith.truncf %8 : vector<16x128xf32> to vector<16x128xbf16>
    %c0_6 = arith.constant 0 : index
    %c0_7 = arith.constant 0 : index
    %10 = vector.load %arg4[%c0_6, %c0_7] : memref<128x128xbf16, #tpu.memory_space<vmem>>, vector<128x128xbf16>
    %cst_8 = arith.constant dense<0.000000e+00> : vector<16x128xf32>
    %11 = tpu.matmul %9, %10, %cst_8 {dimension_numbers = #tpu.dot_dimension_numbers<[1], [0], [0], [1], [0, 0, 1, 1], [], []>} : vector<16x128xbf16>, vector<128x128xbf16>, vector<16x128xf32> -> vector<16x128xf32>
    %c0_9 = arith.constant 0 : index
    %c0_10 = arith.constant 0 : index
    %12 = vector.load %arg5[%c0_9, %c0_10] : memref<1x128xf32, #tpu.memory_space<vmem>>, vector<1x128xf32>
    %13 = vector.broadcast %12 : vector<1x128xf32> to vector<16x128xf32>
    %14 = arith.addf %11, %13 : vector<16x128xf32>
    %cst_11 = arith.constant 0.000000e+00 : f32
    %15 = vector.broadcast %cst_11 : f32 to vector<16x128xf32>
    %16 = arith.maximumf %14, %15 : vector<16x128xf32>
    %17 = arith.truncf %16 : vector<16x128xf32> to vector<16x128xbf16>
    %c0_12 = arith.constant 0 : index
    %c0_13 = arith.constant 0 : index
    %18 = vector.load %arg6[%c0_12, %c0_13] : memref<16x128xbf16, #tpu.memory_space<vmem>>, vector<16x128xbf16>
    tpu.vector_store %arg6[%c0_12, %c0_13], %17 {strides = array<i32>} : memref<16x128xbf16, #tpu.memory_space<vmem>>, vector<16x128xbf16>,
    return
  }
  func.func @transform_0(%arg0: i32) -> (i32, i32) {
    %c0_i32 = arith.constant 0 : i32
    %c0_i32_0 = arith.constant 0 : i32
    return %arg0, %c0_i32 : i32, i32
  }
  func.func @transform_1(%arg0: i32) -> (i32, i32) {
    %c0_i32 = arith.constant 0 : i32
    %c0_i32_0 = arith.constant 0 : i32
    %c0_i32_1 = arith.constant 0 : i32
    return %c0_i32, %c0_i32_0 : i32, i32
  }
  func.func @transform_2(%arg0: i32) -> (i32, i32) {
    %c0_i32 = arith.constant 0 : i32
    %c0_i32_0 = arith.constant 0 : i32
    %c0_i32_1 = arith.constant 0 : i32
    return %c0_i32, %c0_i32_0 : i32, i32
  }
  func.func @transform_3(%arg0: i32) -> (i32, i32) {
    %c0_i32 = arith.constant 0 : i32
    %c0_i32_0 = arith.constant 0 : i32
    %c0_i32_1 = arith.constant 0 : i32
    return %c0_i32, %c0_i32_0 : i32, i32
  }
  func.func @transform_4(%arg0: i32) -> (i32, i32) {
    %c0_i32 = arith.constant 0 : i32
    %c0_i32_0 = arith.constant 0 : i32
    %c0_i32_1 = arith.constant 0 : i32
    return %c0_i32, %c0_i32_0 : i32, i32
  }
  func.func @transform_5(%arg0: i32) -> (i32, i32) {
    %c0_i32 = arith.constant 0 : i32
    %c0_i32_0 = arith.constant 0 : i32
    return %arg0, %c0_i32 : i32, i32
  }
}

</mosaic_0001>

<bundles_post_ra>
// kernel: _mlpnet_forward_impl.1
= control target key start
LH: loop header
LB: loop body
LE: loop exit
PB: predicated region body
PF: predicated region fallthrough
CT: control target
= control target key end

     0   :  { %10 = vsyncpa [#allocation3], 0  ;;  %s514_s0 = inlined_call_operand.hbm [shape: f32[8,32], index: 0, kind: input, shape index: {}]   ;;  %s515_s1 = inlined_call_operand.hbm [shape: bf16[32,128], index: 1, kind: input, shape index: {}]   ;;  %s516_s2 = inlined_call_operand.vmem [shape: f32[1,128], index: 2, kind: input, shape index: {}]   ;;  %s517_s3 = inlined_call_operand.hbm [shape: bf16[128,128], index: 3, kind: input, shape index: {}]   ;;  %s518_s4 = inlined_call_operand.vmem [shape: f32[1,128], index: 4, kind: input, shape index: {}]   ;;  %s519_s5 = inlined_call_operand.hbm [shape: bf16[8,128], index: 5, kind: output, shape index: {}]  }
   0x1   :  { %11 = vsyncpa [#allocation6], 0 }
   0x2   :  { %12 = vsyncpa [#allocation4], 0 }
   0x3   :  { %17 = vsyncadd [#allocation3], 128  ;;  %s447_s18 = smov [#allocation5]  }
   0x4   :  { %s30_s19 = sshll.u32 %s447_s18, 4  ;;  %s31_s19 = int_to_ptr.vmem [resolvable:$true] %s30_s19 }
   0x5   :  { %s369_s20 = scalar_lea.vmem %s31_s19, 256  ;;  %p374_p1 = scmp.lt.s32.totalorder %s31_s19, %s31_s19 }
   0x6   :  { %p370_p0 = scmp.ne.s32.totalorder %s31_s19, %s369_s20  ;;  %p375_p2 = scmp.lt.s32.totalorder %s369_s20, %s369_s20 }
   0x8   :  { %p376_p3 = por %p375_p2, %p374_p1 }
   0xa   :  { %p377_p4 = pnand %p376_p3, %p370_p0 }
   0xc   :  { %380 = shalt.err (!%p377_p4)
}
   0xd   :  { %s448_s21 = smov 64   ;;  %s449_s22 = smov 4  }
   0xe   :  { %36 = dma.hbm_to_vmem [thread:$0]  %s515_s1, 256, %s31_s19, [#allocation6], %s448_s21, %s448_s21, %s449_s22  }
   0xf   :  { %s450_s25 = smov [#allocation2]  }
  0x10   :  { %s18_s26 = sshll.u32 %s450_s25, 4  ;;  %s19_s26 = int_to_ptr.vmem [resolvable:$true] %s18_s26 }
  0x11   :  { %s389_s27 = scalar_lea.vmem %s19_s26, 128  ;;  %s393_s28 = scalar_lea.vmem %s19_s26, 256 }
  0x12   :  { %p390_p5 = scmp.ne.s32.totalorder %s19_s26, %s389_s27  ;;  %p394_p6 = scmp.lt.s32.totalorder %s19_s26, %s19_s26 }
  0x13   :  { %p395_p7 = scmp.lt.s32.totalorder %s393_s28, %s389_s27 }
  0x15   :  { %p396_p8 = por %p395_p7, %p394_p6 }
  0x17   :  { %p397_p9 = pnand %p396_p8, %p390_p5 }
  0x19   :  { %400 = shalt.err (!%p397_p9)
}
  0x1a   :  { %s451_s29 = smov 128   ;;  %s452_s30 = smov 8  }
  0x1b   :  { %24 = dma.hbm_to_vmem [thread:$0]  %s514_s0, 128, %s19_s26, [#allocation3], %s451_s29, %s451_s29, %s452_s30  }
  0x1c   :  { %s453_s8 = smov [#allocation7]  }
  0x1d   :  { %s44_s9 = sshll.u32 %s453_s8, 4  ;;  %s45_s9 = int_to_ptr.vmem [resolvable:$true] %s44_s9 }
  0x1e   :  { %s409_s1 = scalar_lea.vmem %s45_s9, 1024  ;;  %p414_p11 = scmp.lt.s32.totalorder %s45_s9, %s45_s9 }
  0x1f   :  { %p410_p10 = scmp.ne.s32.totalorder %s45_s9, %s409_s1  ;;  %p415_p12 = scmp.lt.s32.totalorder %s409_s1, %s409_s1 }
  0x21   :  { %p416_p13 = por %p415_p12, %p414_p11 }
  0x23   :  { %p417_p0 = pnand %p416_p13, %p410_p10 }
  0x25   :  { %420 = shalt.err (!%p417_p0)
}
  0x26   :  { %50 = dma.hbm_to_vmem [thread:$0]  %s517_s3, 1024, %s45_s9, [#allocation6], %s448_s21, %s448_s21, %s449_s22  }
  0x27   :  { %441 = dma.done.wait [#allocation3], 256  }
  0x28   :  { %442 = vsyncadd [#allocation3], 4294967040 }
  0x29   :  { %443 = dma.done.wait [#allocation6], 1280  }
  0x2a   :  { %444 = vsyncadd [#allocation6], 4294966016  ;;  %v454_v0 = vmov 0.0   ;;  %vm455_vm0 = vmmov 0   ;;  %v351_v1 = vld [vmem:[#allocation5 + $0x8] sm:$0xff]   ;;  %v352_v2 = vld [vmem:[#allocation5] sm:$0xff]  }
  0x2b   :  { %313 = vmatprep.subr.bf16.mxu0 %v454_v0  ;;  %317 = vmatprep.mubr.msk.bf16.mxu0 %vm455_vm0, %v454_v0  ;;  %v63_v3 = vld [vmem:[#allocation2] sm:$0xff]  ;;  %v64_v4 = vld [vmem:[#allocation2 + $0x8] sm:$0xff]  ;;  %v353_v5 = vld [vmem:[#allocation7 + $0x38] sm:$0xff]   ;;  %vm89_vm1 = vcmask 261120  }
  0x2c   :  { %321 = vmatprep.subr.bf16.mxu1 %v454_v0  ;;  %337 = vmatprep.mubr.msk.bf16.mxu1 %vm455_vm0, %v454_v0  ;;  %v65_v6 = vpack.c.bf16 %v64_v4, %v63_v3  ;;  %v354_v7 = vld [vmem:[#allocation7 + $0x30] sm:$0xff]   ;;  %v355_v8 = vld [vmem:[#allocation7 + $0x28] sm:$0xff]   ;;  %v356_v9 = vld [vmem:[#allocation7 + $0x20] sm:$0xff]  }
  0x2d   :  { %314 = vmatpush3.bf16.msra.mxu0 %v351_v1  ;;  %322 = vmatpush3.bf16.msra.mxu1 %v353_v5  ;;  %v357_v10 = vld [vmem:[#allocation7 + $0x18] sm:$0xff]   ;;  %v358_v11 = vld [vmem:[#allocation7 + $0x10] sm:$0xff]   ;;  %v359_v12 = vld [vmem:[#allocation7 + $0x8] sm:$0xff]  }
  0x2e   :  { %315 = vmatprep.subr.bf16.mxu0 %v454_v0  ;;  %323 = vmatprep.subr.bf16.mxu1 %v454_v0  ;;  %v360_v13 = vld [vmem:[#allocation7] sm:$0xff]  }
  0x2f   :  { %v279_v14 = vld [vmem:[%s516_s2] ss:$0 sm:$0xff] }
  0x30   :  { %v283_v24 = vld [vmem:[%s518_s4] ss:$0 sm:$0xff] }
  0x31   :  { %316 = vmatpush3.bf16.msra.mxu0 %v352_v2  ;;  %324 = vmatpush3.bf16.msra.mxu1 %v354_v7 }
  0x32   :  { %325 = vmatprep.subr.bf16.mxu1 %v454_v0 }
  0x34   :  { %318 = vmatmul.mubr.msk.bf16.vlgmr.msra.gmra.mxu0 %vm89_vm1, %v65_v6 }
  0x35   :  { %326 = vmatpush3.bf16.msra.mxu1 %v355_v8 }
  0x36   :  { %327 = vmatprep.subr.bf16.mxu1 %v454_v0 }
  0x39   :  { %328 = vmatpush3.bf16.msra.mxu1 %v356_v9 }
  0x3a   :  { %329 = vmatprep.subr.bf16.mxu1 %v454_v0 }
  0x3d   :  { %330 = vmatpush3.bf16.msra.mxu1 %v357_v10 }
  0x3e   :  { %331 = vmatprep.subr.bf16.mxu1 %v454_v0 }
  0x41   :  { %332 = vmatpush3.bf16.msra.mxu1 %v358_v11 }
  0x42   :  { %333 = vmatprep.subr.bf16.mxu1 %v454_v0 }
  0x45   :  { %334 = vmatpush3.bf16.msra.mxu1 %v359_v12 }
  0x46   :  { %335 = vmatprep.subr.bf16.mxu1 %v454_v0 }
  0x49   :  { %336 = vmatpush3.bf16.msra.mxu1 %v360_v13 }
  0xf4   :  { %v127_v15 = vpop.f32.mrf.mxu0 }
  0xf5   :  { %v128_v17 = vadd.f32 %v279_v14, %v127_v15 }
  0xf6   :  { %v319_v16 = vpop.f32.mrf.mxu0 }
  0xf7   :  { %v134_v21 = vmax.f32 %v128_v17, 0.0 }
  0xf8   :  { %v130_v18 = vpop.f32.mrf.mxu0 }
  0xf9   :  { %v131_v19 = vadd.f32 %v279_v14, %v130_v18 }
  0xfa   :  { %v320_v20 = vpop.f32.mrf.mxu0 }
  0xfb   :  { %v135_v22 = vmax.f32 %v131_v19, 0.0 }
  0xfd   :  { %v136_v23 = vpack.c.bf16 %v135_v22, %v134_v21 }
  0xff   :  { %338 = vmatmul.mubr.bf16.vlgmr.msra.gmra.mxu1 %v136_v23 }
 0x1bf   :  { %v242_v25 = vpop.f32.mrf.mxu1 }
 0x1c0   :  { %v243_v27 = vadd.f32 %v283_v24, %v242_v25 }
 0x1c1   :  { %v339_v26 = vpop.f32.mrf.mxu1 }
 0x1c2   :  { %v249_v31 = vmax.f32 %v243_v27, 0.0 }
 0x1c3   :  { %v245_v28 = vpop.f32.mrf.mxu1 }
 0x1c4   :  { %v246_v29 = vadd.f32 %v283_v24, %v245_v28 }
 0x1c5   :  { %v340_v30 = vpop.f32.mrf.mxu1 }
 0x1c6   :  { %v250_v32 = vmax.f32 %v246_v29, 0.0 }
 0x1c8   :  { %v299_v33 = vpack.c.bf16 %v250_v32, %v249_v31 }
 0x1ca   :  { %300 = vst [vmem:[#allocation8] sm:$0xff] %v299_v33  }
 0x1cb   :  { %265 = vsyncadd [#allocation4], 64  ;;  %s456_s2 = smov [#allocation8]  }
 0x1cc   :  { %s266_s14 = sshll.u32 %s456_s2, 4  ;;  %s267_s14 = int_to_ptr.vmem [resolvable:$true] %s266_s14 }
 0x1cd   :  { %s421_s15 = scalar_lea.vmem %s267_s14, 64  ;;  %s425_s16 = scalar_lea.vmem %s267_s14, 128 }
 0x1ce   :  { %p422_p1 = scmp.ne.s32.totalorder %s267_s14, %s421_s15  ;;  %p426_p2 = scmp.lt.s32.totalorder %s267_s14, %s267_s14 }
 0x1cf   :  { %p427_p3 = scmp.lt.s32.totalorder %s425_s16, %s421_s15 }
 0x1d1   :  { %p428_p4 = por %p427_p3, %p426_p2 }
 0x1d3   :  { %p429_p5 = pnand %p428_p4, %p422_p1 }
 0x1d5   :  { %432 = shalt.err (!%p429_p5)
}
 0x1d6   :  { %272 = dma.vmem_to_hbm [thread:$0]  %s267_s14, 64, %s519_s5, [#allocation4], %s448_s21, %s448_s21, %s449_s22  }
 0x1d7   :  { %445 = dma.done.wait [#allocation4], 128  }
 0x1d8   :  { %446 = vsyncadd [#allocation4], 4294967168 }
 0x1d9   :  { %276 = vsyncpa [#allocation3], 1 }
 0x1da   :  { %277 = vsyncpa [#allocation6], 1 }
 0x1db   :  { %278 = vsyncpa [#allocation4], 1 }

// kernel: _mlpnet_forward_impl.1
= control target key start
LH: loop header
LB: loop body
LE: loop exit
PB: predicated region body
PF: predicated region fallthrough
CT: control target
= control target key end

     0   :  { %10 = vsyncpa [#allocation3], 0  ;;  %s514_s0 = inlined_call_operand.hbm [shape: f32[8,32], index: 0, kind: input, shape index: {}]   ;;  %s515_s1 = inlined_call_operand.hbm [shape: bf16[32,128], index: 1, kind: input, shape index: {}]   ;;  %s516_s2 = inlined_call_operand.vmem [shape: f32[1,128], index: 2, kind: input, shape index: {}]   ;;  %s517_s3 = inlined_call_operand.hbm [shape: bf16[128,128], index: 3, kind: input, shape index: {}]   ;;  %s518_s4 = inlined_call_operand.vmem [shape: f32[1,128], index: 4, kind: input, shape index: {}]   ;;  %s519_s5 = inlined_call_operand.hbm [shape: bf16[8,128], index: 5, kind: output, shape index: {}]  }
   0x1   :  { %11 = vsyncpa [#allocation6], 0 }
   0x2   :  { %12 = vsyncpa [#allocation4], 0 }
   0x3   :  { %17 = vsyncadd [#allocation3], 128  ;;  %s447_s18 = smov [#allocation5]  }
   0x4   :  { %s30_s19 = sshll.u32 %s447_s18, 4  ;;  %s31_s19 = int_to_ptr.vmem [resolvable:$true] %s30_s19 }
   0x5   :  { %s369_s20 = scalar_lea.vmem %s31_s19, 256  ;;  %p374_p1 = scmp.lt.s32.totalorder %s31_s19, %s31_s19 }
   0x6   :  { %p370_p0 = scmp.ne.s32.totalorder %s31_s19, %s369_s20  ;;  %p375_p2 = scmp.lt.s32.totalorder %s369_s20, %s369_s20 }
   0x8   :  { %p376_p3 = por %p375_p2, %p374_p1 }
   0xa   :  { %p377_p4 = pnand %p376_p3, %p370_p0 }
   0xc   :  { %380 = shalt.err (!%p377_p4)
}
   0xd   :  { %s448_s21 = smov 64   ;;  %s449_s22 = smov 4  }
   0xe   :  { %36 = dma.hbm_to_vmem [thread:$0]  %s515_s1, 256, %s31_s19, [#allocation6], %s448_s21, %s448_s21, %s449_s22  }
   0xf   :  { %s450_s25 = smov [#allocation2]  }
  0x10   :  { %s18_s26 = sshll.u32 %s450_s25, 4  ;;  %s19_s26 = int_to_ptr.vmem [resolvable:$true] %s18_s26 }
  0x11   :  { %s389_s27 = scalar_lea.vmem %s19_s26, 128  ;;  %s393_s28 = scalar_lea.vmem %s19_s26, 256 }
  0x12   :  { %p390_p5 = scmp.ne.s32.totalorder %s19_s26, %s389_s27  ;;  %p394_p6 = scmp.lt.s32.totalorder %s19_s26, %s19_s26 }
  0x13   :  { %p395_p7 = scmp.lt.s32.totalorder %s393_s28, %s389_s27 }
  0x15   :  { %p396_p8 = por %p395_p7, %p394_p6 }
  0x17   :  { %p397_p9 = pnand %p396_p8, %p390_p5 }
  0x19   :  { %400 = shalt.err (!%p397_p9)
}
  0x1a   :  { %s451_s29 = smov 128   ;;  %s452_s30 = smov 8  }
  0x1b   :  { %24 = dma.hbm_to_vmem [thread:$0]  %s514_s0, 128, %s19_s26, [#allocation3], %s451_s29, %s451_s29, %s452_s30  }
  0x1c   :  { %s453_s8 = smov [#allocation7]  }
  0x1d   :  { %s44_s9 = sshll.u32 %s453_s8, 4  ;;  %s45_s9 = int_to_ptr.vmem [resolvable:$true] %s44_s9 }
  0x1e   :  { %s409_s1 = scalar_lea.vmem %s45_s9, 1024  ;;  %p414_p11 = scmp.lt.s32.totalorder %s45_s9, %s45_s9 }
  0x1f   :  { %p410_p10 = scmp.ne.s32.totalorder %s45_s9, %s409_s1  ;;  %p415_p12 = scmp.lt.s32.totalorder %s409_s1, %s409_s1 }
  0x21   :  { %p416_p13 = por %p415_p12, %p414_p11 }
  0x23   :  { %p417_p0 = pnand %p416_p13, %p410_p10 }
  0x25   :  { %420 = shalt.err (!%p417_p0)
}
  0x26   :  { %50 = dma.hbm_to_vmem [thread:$0]  %s517_s3, 1024, %s45_s9, [#allocation6], %s448_s21, %s448_s21, %s449_s22  }
  0x27   :  { %441 = dma.done.wait [#allocation3], 256  }
  0x28   :  { %442 = vsyncadd [#allocation3], 4294967040 }
  0x29   :  { %443 = dma.done.wait [#allocation6], 1280  }
  0x2a   :  { %444 = vsyncadd [#allocation6], 4294966016  ;;  %v454_v0 = vmov 0.0   ;;  %vm455_vm0 = vmmov 0   ;;  %v351_v1 = vld [vmem:[#allocation5 + $0x8] sm:$0xff]   ;;  %v352_v2 = vld [vmem:[#allocation5] sm:$0xff]  }
  0x2b   :  { %313 = vmatprep.subr.bf16.mxu0 %v454_v0  ;;  %317 = vmatprep.mubr.msk.bf16.mxu0 %vm455_vm0, %v454_v0  ;;  %v63_v3 = vld [vmem:[#allocation2] sm:$0xff]  ;;  %v64_v4 = vld [vmem:[#allocation2 + $0x8] sm:$0xff]  ;;  %v353_v5 = vld [vmem:[#allocation7 + $0x38] sm:$0xff]   ;;  %vm89_vm1 = vcmask 261120  }
  0x2c   :  { %321 = vmatprep.subr.bf16.mxu1 %v454_v0  ;;  %337 = vmatprep.mubr.msk.bf16.mxu1 %vm455_vm0, %v454_v0  ;;  %v65_v6 = vpack.c.bf16 %v64_v4, %v63_v3  ;;  %v354_v7 = vld [vmem:[#allocation7 + $0x30] sm:$0xff]   ;;  %v355_v8 = vld [vmem:[#allocation7 + $0x28] sm:$0xff]   ;;  %v356_v9 = vld [vmem:[#allocation7 + $0x20] sm:$0xff]  }
  0x2d   :  { %314 = vmatpush3.bf16.msra.mxu0 %v351_v1  ;;  %322 = vmatpush3.bf16.msra.mxu1 %v353_v5  ;;  %v357_v10 = vld [vmem:[#allocation7 + $0x18] sm:$0xff]   ;;  %v358_v11 = vld [vmem:[#allocation7 + $0x10] sm:$0xff]   ;;  %v359_v12 = vld [vmem:[#allocation7 + $0x8] sm:$0xff]  }
  0x2e   :  { %315 = vmatprep.subr.bf16.mxu0 %v454_v0  ;;  %323 = vmatprep.subr.bf16.mxu1 %v454_v0  ;;  %v360_v13 = vld [vmem:[#allocation7] sm:$0xff]  }
  0x2f   :  { %v279_v14 = vld [vmem:[%s516_s2] ss:$0 sm:$0xff] }
  0x30   :  { %v283_v24 = vld [vmem:[%s518_s4] ss:$0 sm:$0xff] }
  0x31   :  { %316 = vmatpush3.bf16.msra.mxu0 %v352_v2  ;;  %324 = vmatpush3.bf16.msra.mxu1 %v354_v7 }
  0x32   :  { %325 = vmatprep.subr.bf16.mxu1 %v454_v0 }
  0x34   :  { %318 = vmatmul.mubr.msk.bf16.vlgmr.msra.gmra.mxu0 %vm89_vm1, %v65_v6 }
  0x35   :  { %326 = vmatpush3.bf16.msra.mxu1 %v355_v8 }
  0x36   :  { %327 = vmatprep.subr.bf16.mxu1 %v454_v0 }
  0x39   :  { %328 = vmatpush3.bf16.msra.mxu1 %v356_v9 }
  0x3a   :  { %329 = vmatprep.subr.bf16.mxu1 %v454_v0 }
  0x3d   :  { %330 = vmatpush3.bf16.msra.mxu1 %v357_v10 }
  0x3e   :  { %331 = vmatprep.subr.bf16.mxu1 %v454_v0 }
  0x41   :  { %332 = vmatpush3.bf16.msra.mxu1 %v358_v11 }
  0x42   :  { %333 = vmatprep.subr.bf16.mxu1 %v454_v0 }
  0x45   :  { %334 = vmatpush3.bf16.msra.mxu1 %v359_v12 }
  0x46   :  { %335 = vmatprep.subr.bf16.mxu1 %v454_v0 }
  0x49   :  { %336 = vmatpush3.bf16.msra.mxu1 %v360_v13 }
  0xf4   :  { %v127_v15 = vpop.f32.mrf.mxu0 }
  0xf5   :  { %v128_v17 = vadd.f32 %v279_v14, %v127_v15 }
  0xf6   :  { %v319_v16 = vpop.f32.mrf.mxu0 }
  0xf7   :  { %v134_v21 = vmax.f32 %v128_v17, 0.0 }
  0xf8   :  { %v130_v18 = vpop.f32.mrf.mxu0 }
  0xf9   :  { %v131_v19 = vadd.f32 %v279_v14, %v130_v18 }
  0xfa   :  { %v320_v20 = vpop.f32.mrf.mxu0 }
  0xfb   :  { %v135_v22 = vmax.f32 %v131_v19, 0.0 }
  0xfd   :  { %v136_v23 = vpack.c.bf16 %v135_v22, %v134_v21 }
  0xff   :  { %338 = vmatmul.mubr.bf16.vlgmr.msra.gmra.mxu1 %v136_v23 }
 0x1bf   :  { %v242_v25 = vpop.f32.mrf.mxu1 }
 0x1c0   :  { %v243_v27 = vadd.f32 %v283_v24, %v242_v25 }
 0x1c1   :  { %v339_v26 = vpop.f32.mrf.mxu1 }
 0x1c2   :  { %v249_v31 = vmax.f32 %v243_v27, 0.0 }
 0x1c3   :  { %v245_v28 = vpop.f32.mrf.mxu1 }
 0x1c4   :  { %v246_v29 = vadd.f32 %v283_v24, %v245_v28 }
 0x1c5   :  { %v340_v30 = vpop.f32.mrf.mxu1 }
 0x1c6   :  { %v250_v32 = vmax.f32 %v246_v29, 0.0 }
 0x1c8   :  { %v299_v33 = vpack.c.bf16 %v250_v32, %v249_v31 }
 0x1ca   :  { %300 = vst [vmem:[#allocation8] sm:$0xff] %v299_v33  }
 0x1cb   :  { %265 = vsyncadd [#allocation4], 64  ;;  %s456_s2 = smov [#allocation8]  }
 0x1cc   :  { %s266_s14 = sshll.u32 %s456_s2, 4  ;;  %s267_s14 = int_to_ptr.vmem [resolvable:$true] %s266_s14 }
 0x1cd   :  { %s421_s15 = scalar_lea.vmem %s267_s14, 64  ;;  %s425_s16 = scalar_lea.vmem %s267_s14, 128 }
 0x1ce   :  { %p422_p1 = scmp.ne.s32.totalorder %s267_s14, %s421_s15  ;;  %p426_p2 = scmp.lt.s32.totalorder %s267_s14, %s267_s14 }
 0x1cf   :  { %p427_p3 = scmp.lt.s32.totalorder %s425_s16, %s421_s15 }
 0x1d1   :  { %p428_p4 = por %p427_p3, %p426_p2 }
 0x1d3   :  { %p429_p5 = pnand %p428_p4, %p422_p1 }
 0x1d5   :  { %432 = shalt.err (!%p429_p5)
}
 0x1d6   :  { %272 = dma.vmem_to_hbm [thread:$0]  %s267_s14, 64, %s519_s5, [#allocation4], %s448_s21, %s448_s21, %s449_s22  }
 0x1d7   :  { %445 = dma.done.wait [#allocation4], 128  }
 0x1d8   :  { %446 = vsyncadd [#allocation4], 4294967168 }
 0x1d9   :  { %276 = vsyncpa [#allocation3], 1 }
 0x1da   :  { %277 = vsyncpa [#allocation6], 1 }
 0x1db   :  { %278 = vsyncpa [#allocation4], 1 }

</bundles_post_ra>
